<compile_context>
chip_gen: v7x
topology: tpu7x:2x2x1
jax: 0.10.0
libtpu: 0.0.40
codegen_flags: <defaults>
</compile_context>

<pallas_src>
import math

import jax
import jax.numpy as jnp
from jax.experimental import pallas as pl
from jax.experimental.pallas import tpu as pltpu

CFG = dict(emb_dim=32)
BATCH = 2
SEQ = 8

_GELU_C = math.sqrt(2.0 / math.pi)


def _gelu(x):
    # GPT-2 tanh approximation.  Factored cubic keeps the polynomial on the
    # VPU (4 VALUs, slack); the tanh uses the EUP slot.
    return 0.5 * x * (1.0 + jnp.tanh(_GELU_C * x * (1.0 + 0.044715 * x * x)))


def ffn_kernel(x_ref, w1_ref, b1_ref, w2_ref, b2_ref, o_ref, acc_ref):
    """One (row-tile, hidden-tile) step of y = GELU(x@W1 + b1) @ W2 + b2."""
    ht = pl.program_id(1)

    @pl.when(ht == 0)
    def _init():
        acc_ref[...] = jnp.zeros_like(acc_ref)

    # bf16 operands on the MXU, f32 accumulation; bias-add + GELU in f32.
    x = x_ref[...].astype(jnp.bfloat16)
    h = jnp.dot(x, w1_ref[...].astype(jnp.bfloat16),
                preferred_element_type=jnp.float32)          # (TM, TH) f32
    h = _gelu(h + b1_ref[...].astype(jnp.float32))
    acc_ref[...] += jnp.dot(h.astype(jnp.bfloat16),
                            w2_ref[...].astype(jnp.bfloat16),
                            preferred_element_type=jnp.float32)  # (TM, E) f32

    @pl.when(ht == pl.num_programs(1) - 1)
    def _finalize():
        o_ref[...] = (acc_ref[...] + b2_ref[...].astype(jnp.float32)).astype(o_ref.dtype)


def _row_tile(M, block_rows):
    tm = min(M, block_rows)
    if M > 64:
        # >= 2 row tiles so dimension_semantics=("parallel", ...) can shard the
        # row axis across both TensorCores on v7x.
        tm = min(tm, pl.cdiv(M, 2))
    if tm != M:
        tm = ((tm + 7) // 8) * 8      # multiple of 8 sublanes once tiled
    return tm


def _hidden_tile(H, block_hidden):
    if H <= block_hidden:
        return H
    return max(128, (block_hidden // 128) * 128)   # lane-aligned hidden tiles


def feed_forward(x, params, *, block_rows=2048, block_hidden=512):
    """x: (..., E) -> (..., E).  Flattens leading dims, tiles rows and hidden dim."""
    w1, b1, w2, b2 = params["w1"], params["b1"], params["w2"], params["b2"]
    orig_shape = x.shape
    E = orig_shape[-1]
    H = w1.shape[1]

    # Position-independent FFN: collapse all leading dims into one row axis.
    x2 = x.reshape(-1, E)
    M = x2.shape[0]

    # bf16 weights halve DMA bytes + resident VMEM; biases stay f32 (tiny).
    w1 = w1.astype(jnp.bfloat16)
    w2 = w2.astype(jnp.bfloat16)
    b1 = b1.reshape(1, -1).astype(jnp.float32)
    b2 = b2.reshape(1, -1).astype(jnp.float32)

    # Row tiling.
    TM = _row_tile(M, block_rows)
    n_rows = pl.cdiv(M, TM)
    M_pad = n_rows * TM
    if M_pad != M:
        x2 = jnp.pad(x2, ((0, M_pad - M), (0, 0)))

    # Hidden-dim (reduction) tiling; zero padding contributes exactly 0.
    TH = _hidden_tile(H, block_hidden)
    n_hid = pl.cdiv(H, TH)
    H_pad = n_hid * TH
    if H_pad != H:
        w1 = jnp.pad(w1, ((0, 0), (0, H_pad - H)))
        b1 = jnp.pad(b1, ((0, 0), (0, H_pad - H)))
        w2 = jnp.pad(w2, ((0, H_pad - H), (0, 0)))

    out_dtype = x.dtype
    out_itemsize = jnp.dtype(out_dtype).itemsize

    # dtype-aware cost estimate (two matmuls + one tanh per hidden element,
    # plus the output write).
    bytes_accessed = (
        x2.size * x2.dtype.itemsize
        + w1.size * w1.dtype.itemsize + b1.size * b1.dtype.itemsize
        + w2.size * w2.dtype.itemsize + b2.size * b2.dtype.itemsize
        + M_pad * E * out_itemsize
    )
    cost = pl.CostEstimate(
        flops=4 * M_pad * E * H_pad,          # two matmuls: 2 * 2*M*E*H
        transcendentals=M_pad * H_pad,        # tanh in GELU
        bytes_accessed=int(bytes_accessed),
    )

    # Per-step VMEM: double-buffered tiles + the f32 accumulator.
    per_step_vmem = (
        2 * TM * E * x2.dtype.itemsize                 # x tile
        + 2 * (E * TH + TH * E) * w1.dtype.itemsize    # W1 / W2 tiles (bf16)
        + 2 * (TH + E) * 4                             # biases (f32)
        + 2 * TM * E * out_itemsize                    # output tile
        + TM * E * 4                                   # accumulator scratch
    )
    vmem_limit = int(min(max(2 * per_step_vmem, 32 * 1024 * 1024), 64 * 1024 * 1024))

    out = pl.pallas_call(
        ffn_kernel,
        out_shape=jax.ShapeDtypeStruct((M_pad, E), out_dtype),
        grid=(n_rows, n_hid),                              # reduction axis last
        in_specs=[
            pl.BlockSpec((TM, E), lambda i, k: (i, 0)),    # activations: row tiles
            pl.BlockSpec((E, TH), lambda i, k: (0, k)),    # W1: hidden-dim tiles
            pl.BlockSpec((1, TH), lambda i, k: (0, k)),    # b1
            pl.BlockSpec((TH, E), lambda i, k: (k, 0)),    # W2: hidden-dim tiles
            pl.BlockSpec((1, E), lambda i, k: (0, 0)),     # b2: resident
        ],
        out_specs=pl.BlockSpec((TM, E), lambda i, k: (i, 0)),
        scratch_shapes=[pltpu.VMEM((TM, E), jnp.float32)], # f32 accumulator
        compiler_params=pltpu.CompilerParams(
            dimension_semantics=("parallel", "arbitrary"),
            vmem_limit_bytes=vmem_limit,
        ),
        cost_estimate=cost,
    )(x2, w1, b1, w2, b2)

    if M_pad != M:
        out = out[:M]
    return out.reshape(orig_shape)


# ---------------- pure-JAX reference for verification ----------------
def reference_ffn(x, p):
    h = x @ p["w1"] + p["b1"]
    h = 0.5 * h * (1.0 + jnp.tanh(math.sqrt(2.0 / math.pi) * (h + 0.044715 * h ** 3)))
    return h @ p["w2"] + p["b2"]


if __name__ == "__main__":
    E = CFG["emb_dim"]
    H = 4 * E
    key = jax.random.PRNGKey(0)
    k1, k2, k3, k4, k5 = jax.random.split(key, 5)

    params = {
        "w1": 0.02 * jax.random.normal(k1, (E, H), jnp.float32),
        "b1": 0.01 * jax.random.normal(k2, (1, H), jnp.float32),
        "w2": 0.02 * jax.random.normal(k3, (H, E), jnp.float32),
        "b2": 0.01 * jax.random.normal(k4, (1, E), jnp.float32),
    }

    x = jax.random.normal(k5, (BATCH, SEQ, E), jnp.float32)

    out = jax.block_until_ready(feed_forward(x, params))
    ref = reference_ffn(x, params)

    assert out.shape == (BATCH, SEQ, E)
    # bf16 MXU operands (f32 accumulation) -> looser tolerance than pure f32.
    max_err = float(jnp.max(jnp.abs(out - ref)))
    assert jnp.allclose(out, ref, atol=5e-3, rtol=5e-2), max_err

    print("KERNEL_OK")
</pallas_src>

<mosaic_0001>
module attributes {stable_mosaic.version = 11 : i64} {
  func.func @ffn_kernel(%arg0: i32, %arg1: i32, %arg2: memref<16x32xf32, #tpu.memory_space<vmem>>, %arg3: memref<32x128xbf16, #tpu.memory_space<vmem>>, %arg4: memref<1x128xf32, #tpu.memory_space<vmem>>, %arg5: memref<128x32xbf16, #tpu.memory_space<vmem>>, %arg6: memref<1x32xf32, #tpu.memory_space<vmem>>, %arg7: memref<16x32xf32, #tpu.memory_space<vmem>>, %arg8: memref<16x32xf32, #tpu.memory_space<vmem>>) attributes {dimension_semantics = [#tpu.dimension_semantics<parallel>, #tpu.dimension_semantics<arbitrary>], iteration_bounds = array<i64: 1, 1>, scalar_prefetch = 0 : i64, scratch_operands = 1 : i64, tpu.core_type = #tpu.core_type<tc>, window_params = [{transform_indices = @transform_0, window_bounds = array<i64: 16, 32>}, {transform_indices = @transform_1, window_bounds = array<i64: 32, 128>}, {transform_indices = @transform_2, window_bounds = array<i64: 1, 128>}, {transform_indices = @transform_3, window_bounds = array<i64: 128, 32>}, {pipeline_mode = #tpu.pipeline_mode<synchronous>, transform_indices = @transform_4, window_bounds = array<i64: 1, 32>}, {transform_indices = @transform_5, window_bounds = array<i64: 16, 32>}]} {
    %c0_i32 = arith.constant 0 : i32
    %0 = arith.cmpi eq, %arg1, %c0_i32 : i32
    %1 = arith.extui %0 : i1 to i32
    %c0_i32_0 = arith.constant 0 : i32
    %2 = arith.cmpi ne, %1, %c0_i32_0 : i32
    scf.if %2 {
      %cst_20 = arith.constant 0.000000e+00 : f32
      %33 = vector.broadcast %cst_20 : f32 to vector<16x32xf32>
      %c0_21 = arith.constant 0 : index
      %c0_22 = arith.constant 0 : index
      %34 = vector.load %arg8[%c0_21, %c0_22] : memref<16x32xf32, #tpu.memory_space<vmem>>, vector<16x32xf32>
      tpu.vector_store %arg8[%c0_21, %c0_22], %33 {strides = array<i32>} : memref<16x32xf32, #tpu.memory_space<vmem>>, vector<16x32xf32>,
    } else {
    }
    %c0 = arith.constant 0 : index
    %c0_1 = arith.constant 0 : index
    %3 = vector.load %arg2[%c0, %c0_1] : memref<16x32xf32, #tpu.memory_space<vmem>>, vector<16x32xf32>
    %4 = arith.truncf %3 : vector<16x32xf32> to vector<16x32xbf16>
    %c0_2 = arith.constant 0 : index
    %c0_3 = arith.constant 0 : index
    %5 = vector.load %arg3[%c0_2, %c0_3] : memref<32x128xbf16, #tpu.memory_space<vmem>>, vector<32x128xbf16>
    %cst = arith.constant dense<0.000000e+00> : vector<16x128xf32>
    %6 = tpu.matmul %4, %5, %cst {dimension_numbers = #tpu.dot_dimension_numbers<[1], [0], [0], [1], [0, 0, 1, 1], [], []>} : vector<16x32xbf16>, vector<32x128xbf16>, vector<16x128xf32> -> vector<16x128xf32>
    %c0_4 = arith.constant 0 : index
    %c0_5 = arith.constant 0 : index
    %7 = vector.load %arg4[%c0_4, %c0_5] : memref<1x128xf32, #tpu.memory_space<vmem>>, vector<1x128xf32>
    %8 = vector.broadcast %7 : vector<1x128xf32> to vector<16x128xf32>
    %9 = arith.addf %6, %8 : vector<16x128xf32>
    %cst_6 = arith.constant 5.000000e-01 : f32
    %10 = vector.broadcast %cst_6 : f32 to vector<16x128xf32>
    %11 = arith.mulf %10, %9 : vector<16x128xf32>
    %cst_7 = arith.constant 0.797884583 : f32
    %12 = vector.broadcast %cst_7 : f32 to vector<16x128xf32>
    %13 = arith.mulf %12, %9 : vector<16x128xf32>
    %cst_8 = arith.constant 4.471500e-02 : f32
    %14 = vector.broadcast %cst_8 : f32 to vector<16x128xf32>
    %15 = arith.mulf %14, %9 : vector<16x128xf32>
    %16 = arith.mulf %15, %9 : vector<16x128xf32>
    %cst_9 = arith.constant 1.000000e+00 : f32
    %17 = vector.broadcast %cst_9 : f32 to vector<16x128xf32>
    %18 = arith.addf %17, %16 : vector<16x128xf32>
    %19 = arith.mulf %13, %18 : vector<16x128xf32>
    %20 = math.tanh %19 : vector<16x128xf32>
    %cst_10 = arith.constant 1.000000e+00 : f32
    %21 = vector.broadcast %cst_10 : f32 to vector<16x128xf32>
    %22 = arith.addf %21, %20 : vector<16x128xf32>
    %23 = arith.mulf %11, %22 : vector<16x128xf32>
    %c0_11 = arith.constant 0 : index
    %c0_12 = arith.constant 0 : index
    %24 = vector.load %arg8[%c0_11, %c0_12] : memref<16x32xf32, #tpu.memory_space<vmem>>, vector<16x32xf32>
    %25 = arith.truncf %23 : vector<16x128xf32> to vector<16x128xbf16>
    %c0_13 = arith.constant 0 : index
    %c0_14 = arith.constant 0 : index
    %26 = vector.load %arg5[%c0_13, %c0_14] : memref<128x32xbf16, #tpu.memory_space<vmem>>, vector<128x32xbf16>
    %cst_15 = arith.constant dense<0.000000e+00> : vector<16x32xf32>
    %27 = tpu.matmul %25, %26, %cst_15 {dimension_numbers = #tpu.dot_dimension_numbers<[1], [0], [0], [1], [0, 0, 1, 1], [], []>} : vector<16x128xbf16>, vector<128x32xbf16>, vector<16x32xf32> -> vector<16x32xf32>
    %28 = arith.addf %24, %27 : vector<16x32xf32>
    %c0_16 = arith.constant 0 : index
    %c0_17 = arith.constant 0 : index
    %29 = vector.load %arg8[%c0_16, %c0_17] : memref<16x32xf32, #tpu.memory_space<vmem>>, vector<16x32xf32>
    tpu.vector_store %arg8[%c0_16, %c0_17], %28 {strides = array<i32>} : memref<16x32xf32, #tpu.memory_space<vmem>>, vector<16x32xf32>,
    %c0_i32_18 = arith.constant 0 : i32
    %30 = arith.cmpi eq, %arg1, %c0_i32_18 : i32
    %31 = arith.extui %30 : i1 to i32
    %c0_i32_19 = arith.constant 0 : i32
    %32 = arith.cmpi ne, %31, %c0_i32_19 : i32
    scf.if %32 {
      %c0_20 = arith.constant 0 : index
      %c0_21 = arith.constant 0 : index
      %33 = vector.load %arg8[%c0_20, %c0_21] : memref<16x32xf32, #tpu.memory_space<vmem>>, vector<16x32xf32>
      %c0_22 = arith.constant 0 : index
      %c0_23 = arith.constant 0 : index
      %34 = vector.load %arg6[%c0_22, %c0_23] : memref<1x32xf32, #tpu.memory_space<vmem>>, vector<1x32xf32>
      %35 = vector.broadcast %34 : vector<1x32xf32> to vector<16x32xf32>
      %36 = arith.addf %33, %35 : vector<16x32xf32>
      %c0_24 = arith.constant 0 : index
      %c0_25 = arith.constant 0 : index
      %37 = vector.load %arg7[%c0_24, %c0_25] : memref<16x32xf32, #tpu.memory_space<vmem>>, vector<16x32xf32>
      tpu.vector_store %arg7[%c0_24, %c0_25], %36 {strides = array<i32>} : memref<16x32xf32, #tpu.memory_space<vmem>>, vector<16x32xf32>,
    } else {
    }
    return
  }
  func.func @transform_0(%arg0: i32, %arg1: i32) -> (i32, i32) {
    %c0_i32 = arith.constant 0 : i32
    %c0_i32_0 = arith.constant 0 : i32
    return %arg0, %c0_i32 : i32, i32
  }
  func.func @transform_1(%arg0: i32, %arg1: i32) -> (i32, i32) {
    %c0_i32 = arith.constant 0 : i32
    %c0_i32_0 = arith.constant 0 : i32
    return %c0_i32, %arg1 : i32, i32
  }
  func.func @transform_2(%arg0: i32, %arg1: i32) -> (i32, i32) {
    %c0_i32 = arith.constant 0 : i32
    %c0_i32_0 = arith.constant 0 : i32
    return %c0_i32, %arg1 : i32, i32
  }
  func.func @transform_3(%arg0: i32, %arg1: i32) -> (i32, i32) {
    %c0_i32 = arith.constant 0 : i32
    %c0_i32_0 = arith.constant 0 : i32
    return %arg1, %c0_i32 : i32, i32
  }
  func.func @transform_4(%arg0: i32, %arg1: i32) -> (i32, i32) {
    %c0_i32 = arith.constant 0 : i32
    %c0_i32_0 = arith.constant 0 : i32
    %c0_i32_1 = arith.constant 0 : i32
    return %c0_i32, %c0_i32_0 : i32, i32
  }
  func.func @transform_5(%arg0: i32, %arg1: i32) -> (i32, i32) {
    %c0_i32 = arith.constant 0 : i32
    %c0_i32_0 = arith.constant 0 : i32
    return %arg0, %c0_i32 : i32, i32
  }
}

</mosaic_0001>

<bundles_post_ra>
// kernel: tpu_custom_call.1
= control target key start
LH: loop header
LB: loop body
LE: loop exit
PB: predicated region body
PF: predicated region fallthrough
CT: control target
= control target key end

     0   :  { %v358_v1 = vmov 0.0   ;;  %vm359_vm0 = vmmov 0   ;;  %vm26_vm1 = vcmask 261120   ;;  %s454_s0 = inlined_call_operand.vmem [shape: f32[16,32], index: 0, kind: input, shape index: {}]   ;;  %s455_s1 = inlined_call_operand.vmem [shape: bf16[32,128], index: 1, kind: input, shape index: {}]   ;;  %s456_s2 = inlined_call_operand.vmem [shape: f32[1,128], index: 2, kind: input, shape index: {}]   ;;  %s457_s3 = inlined_call_operand.vmem [shape: bf16[128,32], index: 3, kind: input, shape index: {}]   ;;  %s458_s4 = inlined_call_operand.vmem [shape: f32[1,32], index: 4, kind: input, shape index: {}]   ;;  %s459_s5 = inlined_call_operand.hbm [shape: f32[16,32], index: 5, kind: output, shape index: {}]  }
   0x1   :  { %v320_v0 = vld [vmem:[%s455_s1] sm:$0xff]   ;;  %287 = vmatprep.subr.bf16.mxu0 %v358_v1  ;;  %v321_v2 = vld [vmem:[%s455_s1 + $0x8] sm:$0xff]   ;;  %295 = vmatprep.subr.bf16.mxu1 %v358_v1  ;;  %27 = vst.msk [vmem:[#allocation2] sm:$0xff] %vm26_vm1, %v358_v1  ;;  %28 = vst.msk [vmem:[#allocation2 + $0x8] sm:$0xff] %vm26_vm1, %v358_v1 }
   0x2   :  { %288 = vmatpush3.bf16.msra.mxu0 %v320_v0  ;;  %291 = vmatprep.mubr.msk.bf16.mxu0 %vm359_vm0, %v358_v1  ;;  %v29_v3 = vld [vmem:[%s454_s0] sm:$0xff]  ;;  %v30_v4 = vld [vmem:[%s454_s0 + $0x8] sm:$0xff] }
   0x3   :  { %289 = vmatprep.subr.bf16.mxu0 %v358_v1  ;;  %v322_v5 = vld [vmem:[%s457_s3] sm:$0xff]   ;;  %311 = vmatprep.mubr.msk.bf16.mxu1 %vm359_vm0, %v358_v1  ;;  %v31_v6 = vpack.c.bf16 %v30_v4, %v29_v3 }
   0x4   :  { %296 = vmatpush3.bf16.msra.mxu1 %v322_v5 }
   0x5   :  { %297 = vmatprep.subr.bf16.mxu1 %v358_v1 }
   0x6   :  { %290 = vmatpush3.bf16.msra.mxu0 %v321_v2 }
   0x7   :  { %10 = vsyncpa [#allocation4], 0  ;;  %v323_v7 = vld [vmem:[%s457_s3 + $0x8] sm:$0xff]   ;;  %v324_v8 = vld [vmem:[%s457_s3 + $0x10] sm:$0xff]   ;;  %s360_s17 = smov [#allocation3]  }
   0x8   :  { %298 = vmatpush3.bf16.msra.mxu1 %v323_v7  ;;  %v325_v9 = vld [vmem:[%s457_s3 + $0x18] sm:$0xff]   ;;  %v326_v10 = vld [vmem:[%s457_s3 + $0x20] sm:$0xff]   ;;  %v327_v11 = vld [vmem:[%s457_s3 + $0x28] sm:$0xff]   ;;  %s251_s18 = sshll.u32 %s360_s17, 4  ;;  %s252_s18 = int_to_ptr.vmem [resolvable:$true] %s251_s18 }
   0x9   :  { %292 = vmatmul.mubr.msk.bf16.vlgmr.msra.gmra.mrb[0].mxu0 %vm26_vm1, %v31_v6  ;;  %299 = vmatprep.subr.bf16.mxu1 %v358_v1  ;;  %v328_v12 = vld [vmem:[%s457_s3 + $0x30] sm:$0xff]   ;;  %v329_v13 = vld [vmem:[%s457_s3 + $0x38] sm:$0xff]   ;;  %v262_v14 = vld [vmem:[%s456_s2] ss:$0 sm:$0xff]  ;;  %s334_s19 = scalar_lea.vmem %s252_s18, 256  ;;  %p339_p1 = scmp.lt.s32.totalorder %s252_s18, %s252_s18 }
   0xa   :  { %v118_v40 = vld [vmem:[#allocation2] sm:$0xff]  ;;  %v119_v42 = vld [vmem:[#allocation2 + $0x8] sm:$0xff]  ;;  %p335_p0 = scmp.ne.s32.totalorder %s252_s18, %s334_s19  ;;  %p340_p2 = scmp.lt.s32.totalorder %s334_s19, %s334_s19 }
   0xb   :  { %v274_v48 = vld [vmem:[%s458_s4] ss:$0 sm:$0xff] }
   0xc   :  { %300 = vmatpush3.bf16.msra.mxu1 %v324_v8  ;;  %p341_p3 = por %p340_p2, %p339_p1 }
   0xd   :  { %301 = vmatprep.subr.bf16.mxu1 %v358_v1 }
   0xe   :  { %p342_p4 = pnand %p341_p3, %p335_p0 }
  0x10   :  { %302 = vmatpush3.bf16.msra.mxu1 %v325_v9 }
  0x11   :  { %303 = vmatprep.subr.bf16.mxu1 %v358_v1 }
  0x14   :  { %304 = vmatpush3.bf16.msra.mxu1 %v326_v10 }
  0x15   :  { %305 = vmatprep.subr.bf16.mxu1 %v358_v1 }
  0x18   :  { %306 = vmatpush3.bf16.msra.mxu1 %v327_v11 }
  0x19   :  { %307 = vmatprep.subr.bf16.mxu1 %v358_v1 }
  0x1c   :  { %308 = vmatpush3.bf16.msra.mxu1 %v328_v12 }
  0x1d   :  { %309 = vmatprep.subr.bf16.mxu1 %v358_v1 }
  0x20   :  { %310 = vmatpush3.bf16.msra.mxu1 %v329_v13 }
  0xdc   :  { %v93_v15 = vpop.f32.mrb[0].mxu0 }
  0xdd   :  { %v94_v16 = vadd.f32 %v262_v14, %v93_v15  ;;  %v293_v17 = vpop.f32.mrb[1].mxu0 }
  0xde   :  { %v96_v18 = vpop.f32.mrb[2].mxu0 }
  0xdf   :  { %v104_v19 = vmul.f32 0.044715, %v94_v16  ;;  %v97_v20 = vadd.f32 %v262_v14, %v96_v18  ;;  %v294_v21 = vpop.f32.mrb[3].mxu0  ;;  %v102_v24 = vmul.f32 0.7978846, %v94_v16  ;;  %v100_v34 = vmul.f32 0.5, %v94_v16 }
  0xe1   :  { %v106_v22 = vmul.f32 %v104_v19, %v94_v16  ;;  %v105_v23 = vmul.f32 0.044715, %v97_v20  ;;  %v103_v28 = vmul.f32 0.7978846, %v97_v20  ;;  %v101_v35 = vmul.f32 0.5, %v97_v20 }
  0xe3   :  { %v108_v25 = vadd.f32 1.0, %v106_v22  ;;  %v107_v26 = vmul.f32 %v105_v23, %v97_v20 }
  0xe5   :  { %v110_v27 = vmul.f32 %v108_v25, %v102_v24  ;;  %v109_v29 = vadd.f32 1.0, %v107_v26 }
  0xe7   :  { %v111_v30 = vmul.f32 %v109_v29, %v103_v28  ;;  %330 = vtanh.f32 %v110_v27 }
  0xe9   :  { %332 = vtanh.f32 %v111_v30 }
  0xf1   :  { %v331_v31 = vpop.eup %330 }
  0xf2   :  { %v114_v32 = vadd.f32 1.0, %v331_v31 }
  0xf3   :  { %v333_v33 = vpop.eup %332 }
  0xf4   :  { %v115_v36 = vadd.f32 1.0, %v333_v33  ;;  %v116_v37 = vmul.f32 %v114_v32, %v100_v34 }
  0xf6   :  { %v117_v38 = vmul.f32 %v115_v36, %v101_v35 }
  0xf8   :  { %v120_v39 = vpack.c.bf16 %v117_v38, %v116_v37 }
  0xfa   :  { %312 = vmatmul.mubr.bf16.vlgmr.msra.gmra.mrb[0].mxu1 %v120_v39 }
 0x1cd   :  { %v219_v41 = vpop.f32.mrb[0].mxu1 }
 0x1ce   :  { %v226_v43 = vadd.f32 %v219_v41, %v118_v40  ;;  %v313_v44 = vpop.f32.mrb[1].mxu1 }
 0x1cf   :  { %v222_v45 = vpop.f32.mrb[2].mxu1 }
 0x1d0   :  { %228 = vst.msk [vmem:[#allocation2] sm:$0xff] %vm26_vm1, %v226_v43  ;;  %v227_v46 = vadd.f32 %v222_v45, %v119_v42  ;;  %v314_v47 = vpop.f32.mrb[3].mxu1 }
 0x1d2   :  { %229 = vst.msk [vmem:[#allocation2 + $0x8] sm:$0xff] %vm26_vm1, %v227_v46 }
 0x1d7   :  { %v233_v49 = vld [vmem:[#allocation2] sm:$0xff] }
 0x1d8   :  { %v242_v50 = vadd.f32 %v274_v48, %v233_v49 }
 0x1d9   :  { %v234_v51 = vld [vmem:[#allocation2 + $0x8] sm:$0xff] }
 0x1da   :  { %v243_v52 = vadd.f32 %v274_v48, %v234_v51  ;;  %244 = vst.msk [vmem:[#allocation3] sm:$0xff] %vm26_vm1, %v242_v50 }
 0x1dc   :  { %245 = vst.msk [vmem:[#allocation3 + $0x8] sm:$0xff] %vm26_vm1, %v243_v52 }
 0x1dd   :  { %345 = shalt.err (!%p342_p4)
}
 0x1de   :  { %s346_s21 = scalar_lea.hbm %s459_s5, 256 }
 0x1df   :  { %p347_p5 = scmp.ne.s32.totalorder %s459_s5, %s346_s21  ;;  %p350_p6 = scmp.lt.u32.totalorder %s346_s21, %s459_s5 }
 0x1e1   :  { %p352_p7 = pnand %p350_p6, %p347_p5 }
 0x1e3   :  { %355 = shalt.err (!%p352_p7)
}
 0x1e4   :  { %s361_s26 = smov 128   ;;  %s362_s1 = smov 8  }
 0x1e5   :  { %257 = dma.vmem_to_hbm [thread:$0]  %s252_s18, 256, %s459_s5, [#allocation4], %s361_s26, %s361_s26, %s362_s1  }
 0x1e6   :  { %356 = dma.done.wait [#allocation4], 256  }
 0x1e7   :  { %357 = vsyncadd [#allocation4], 4294967040 }
 0x1e8   :  { %261 = vsyncpa [#allocation4], 1 }

</bundles_post_ra>
